<compile_context>
chip_gen: v7x
topology: tpu7x:2x2x1
jax: 0.10.0
libtpu: 0.0.40
codegen_flags: <defaults>
</compile_context>

<pallas_src>
import jax
import jax.numpy as jnp
from jax.experimental import pallas as pl
from jax.experimental.pallas import tpu as pltpu


def lstm_seq_kernel(x_ref, h0_ref, c0_ref,
                    emb_gates_ref, w_hh_ref, b_gates_ref,
                    w_fc_ref, b_fc_ref,
                    out_ref, h_out_ref, c_out_ref,
                    xg_ref):
    """T fused LSTM steps: folded-embedding gather, recurrent loop, fc logits.

    x_ref        : [T*B, 1]     int32   character indices, all steps
    h0_ref/c0_ref: [B, H]       f32     initial recurrent state
    emb_gates_ref: [V_pad, 4H]  bf16    embedding @ W_ih folded table (i,f,o,g order)
    w_hh_ref     : [H, 4H]      bf16    recurrent weight (i,f,o,g order, [in, out])
    b_gates_ref  : [1, 4H]      f32     b_ih + b_hh (i,f,o,g order)
    w_fc_ref     : [H, V_pad]   bf16
    b_fc_ref     : [1, V_pad]   f32
    out_ref      : [T*B, V_pad] f32     per-step logits (step-major)
    h_out_ref/c_out_ref: [B, H] f32     final recurrent state (aliased with h0/c0)
    xg_ref       : [T*B, 4H]    f32     scratch: precomputed input-side gate contributions
    """
    TB = x_ref.shape[0]
    B, H = h0_ref.shape
    V_pad = emb_gates_ref.shape[0]
    T = TB // B

    # ---- One MXU pass for ALL steps: one-hot gather through the folded
    #      embedding/input-gate table, bias added once. Exact row selection
    #      (one-hot is 0/1, f32 accumulation). ----
    lane = jax.lax.broadcasted_iota(jnp.int32, (TB, V_pad), 1)           # [TB, V_pad]
    onehot = (lane == x_ref[...]).astype(emb_gates_ref.dtype)            # [TB, V_pad] bf16
    xg_ref[...] = (jnp.dot(onehot, emb_gates_ref[...],
                           preferred_element_type=jnp.float32)
                   + b_gates_ref[...])                                    # [TB, 4H] f32

    # ---- Recurrent state lives in the (aliased) output refs. ----
    h_out_ref[...] = h0_ref[...]
    c_out_ref[...] = c0_ref[...]

    # ---- Sequential time loop; weights stay VMEM-resident across steps. ----
    @pl.loop(0, T)
    def _(t):
        start = pl.multiple_of(t * B, B)                                  # sublane-aligned (B % 8 == 0)
        xg = xg_ref[pl.ds(start, B), :]                                   # [B, 4H] f32

        h_prev = h_out_ref[...]                                           # [B, H] f32
        gates = xg + jnp.dot(h_prev.astype(w_hh_ref.dtype), w_hh_ref[...],
                             preferred_element_type=jnp.float32)          # [B, 4H] f32

        # Gate order (i, f, o, g): one sigmoid over the first 3H, tanh on last H.
        sig = jax.nn.sigmoid(gates[:, : 3 * H])
        i_g = sig[:, 0 * H:1 * H]
        f_g = sig[:, 1 * H:2 * H]
        o_g = sig[:, 2 * H:3 * H]
        g_g = jnp.tanh(gates[:, 3 * H:])

        c_new = f_g * c_out_ref[...] + i_g * g_g
        h_new = o_g * jnp.tanh(c_new)
        c_out_ref[...] = c_new
        h_out_ref[...] = h_new

        # Output projection to (padded, lane-dense) vocab logits.
        out_ref[pl.ds(start, B), :] = (
            jnp.dot(h_new.astype(w_fc_ref.dtype), w_fc_ref[...],
                    preferred_element_type=jnp.float32)
            + b_fc_ref[...])


def rnn_forward_seq(x_seq, hidden, cell, params, *, vocab_size):
    """Run T fused steps of RNN.forward inside one pallas_call.

    x_seq : int32 [T, B]  character indices
    hidden: f32   [1, B, H]
    cell  : f32   [1, B, H]
    Returns (logits [T, B, vocab_size], hidden [1, B, H], cell [1, B, H]).
    """
    emb_gates = params["emb_gates"]     # [V_pad, 4H] bf16
    w_hh = params["w_hh"]               # [H, 4H]     bf16
    b_gates = params["b_gates"]         # [1, 4H]     f32
    w_fc = params["w_fc"]               # [H, V_pad]  bf16
    b_fc = params["b_fc"]               # [1, V_pad]  f32

    T, B = x_seq.shape
    H = hidden.shape[-1]
    V_pad = w_fc.shape[1]
    TB = T * B

    x2d = x_seq.astype(jnp.int32).reshape(TB, 1)
    h0 = hidden[0]                      # [B, H]
    c0 = cell[0]                        # [B, H]

    vmem = pl.BlockSpec(memory_space=pltpu.MemorySpace.VMEM)
    ins = (x2d, h0, c0, emb_gates, w_hh, b_gates, w_fc, b_fc)

    flops = int(2 * TB * V_pad * 4 * H            # folded embedding/input-gate matmul (all steps)
                + T * 2 * B * H * 4 * H           # recurrent gate matmuls
                + T * 2 * B * H * V_pad           # fc matmuls
                + T * 12 * B * H)                 # elementwise LSTM update
    transcendentals = int(T * B * 5 * H)          # 3H sigmoid + 2H tanh per step/row
    bytes_accessed = int(sum(a.size * a.dtype.itemsize for a in ins)
                         + 4 * (TB * V_pad + 2 * B * H))

    out, h_new, c_new = pl.pallas_call(
        lstm_seq_kernel,
        in_specs=[vmem] * 8,
        out_specs=[vmem] * 3,
        out_shape=[
            jax.ShapeDtypeStruct((TB, V_pad), jnp.float32),
            jax.ShapeDtypeStruct((B, H), jnp.float32),
            jax.ShapeDtypeStruct((B, H), jnp.float32),
        ],
        scratch_shapes=[pltpu.VMEM((TB, 4 * H), jnp.float32)],
        # Recurrent state is updated in place: h0 -> h_out, c0 -> c_out.
        input_output_aliases={1: 1, 2: 2},
        cost_estimate=pl.CostEstimate(flops=flops,
                                      transcendentals=transcendentals,
                                      bytes_accessed=bytes_accessed),
    )(*ins)

    logits = out.reshape(T, B, V_pad)[..., :vocab_size]   # drop padded vocab columns
    return logits, h_new[None], c_new[None]


def rnn_forward(x, hidden, cell, params, *, vocab_size):
    """Exact equivalent of the PyTorch module's single-step forward(x, hidden, cell)."""
    logits, h, c = rnn_forward_seq(x[None, :], hidden, cell, params,
                                   vocab_size=vocab_size)
    return logits[0], h, c                                  # ([B, V], [1,B,H], [1,B,H])


# ----------------------------- parameter handling -----------------------------

def init_canonical_params(key, vocab_size, embed_dim, hidden_size):
    """f32 parameters in PyTorch-convention layout/gate order (i, f, g, o)."""
    ks = jax.random.split(key, 7)
    s = 0.1
    return {
        "embedding": s * jax.random.normal(ks[0], (vocab_size, embed_dim), jnp.float32),
        # stored [in, out] (already transposed vs torch's [out, in])
        "w_ih": s * jax.random.normal(ks[1], (embed_dim, 4 * hidden_size), jnp.float32),
        "w_hh": s * jax.random.normal(ks[2], (hidden_size, 4 * hidden_size), jnp.float32),
        "b_ih": s * jax.random.normal(ks[3], (1, 4 * hidden_size), jnp.float32),
        "b_hh": s * jax.random.normal(ks[4], (1, 4 * hidden_size), jnp.float32),
        "w_fc": s * jax.random.normal(ks[5], (hidden_size, vocab_size), jnp.float32),
        "b_fc": s * jax.random.normal(ks[6], (1, vocab_size), jnp.float32),
    }


def pack_params(canon, lane=128):
    """Build kernel params: fold embedding into W_ih, permute gates to (i,f,o,g),
    pad vocab to a lane multiple, cast MXU operands once to bf16."""
    V, _E = canon["embedding"].shape
    H = canon["w_hh"].shape[0]
    V_pad = ((V + lane - 1) // lane) * lane

    def perm(w):  # (i, f, g, o) columns -> (i, f, o, g)
        i, f, g, o = jnp.split(w, 4, axis=-1)
        return jnp.concatenate([i, f, o, g], axis=-1)

    emb_pad = jnp.zeros((V_pad, canon["embedding"].shape[1]), jnp.float32
                        ).at[:V].set(canon["embedding"])
    # Fold in f32, single cast to bf16 (avoids double rounding).
    emb_gates = (emb_pad @ perm(canon["w_ih"])).astype(jnp.bfloat16)       # [V_pad, 4H]

    w_hh = perm(canon["w_hh"]).astype(jnp.bfloat16)                        # [H, 4H]
    b_gates = perm(canon["b_ih"] + canon["b_hh"])                          # [1, 4H] f32

    w_fc = (jnp.zeros((H, V_pad), jnp.float32).at[:, :V].set(canon["w_fc"])
            ).astype(jnp.bfloat16)                                         # [H, V_pad]
    b_fc = jnp.zeros((1, V_pad), jnp.float32).at[:, :V].set(canon["b_fc"]) # [1, V_pad]

    return {"emb_gates": emb_gates, "w_hh": w_hh, "b_gates": b_gates,
            "w_fc": w_fc, "b_fc": b_fc}


# --------------------------------- reference ----------------------------------

def _reference_forward_seq(x_seq, hidden, cell, canon):
    """Pure-JAX f32 reference of T applications of the module's forward."""
    emb, w_ih, w_hh = canon["embedding"], canon["w_ih"], canon["w_hh"]
    b = canon["b_ih"] + canon["b_hh"]
    w_fc, b_fc = canon["w_fc"], canon["b_fc"]
    h, c = hidden[0], cell[0]
    H = h.shape[1]
    outs = []
    for t in range(x_seq.shape[0]):
        e = emb[x_seq[t]]
        gates = e @ w_ih + h @ w_hh + b
        i = jax.nn.sigmoid(gates[:, 0 * H:1 * H])
        f = jax.nn.sigmoid(gates[:, 1 * H:2 * H])
        g = jnp.tanh(gates[:, 2 * H:3 * H])
        o = jax.nn.sigmoid(gates[:, 3 * H:4 * H])
        c = f * c + i * g
        h = o * jnp.tanh(c)
        outs.append(h @ w_fc + b_fc)
    return jnp.stack(outs), h[None], c[None]


if __name__ == "__main__":
    # Small shapes consistent with the module (real: V~80, E=256, H=512, B=64).
    # V=80 exercises the vocab padding (-> 128); E, H multiples of 128 keep all
    # slices lane-dense; B=8 is sublane-aligned; T=16 exercises the fused loop.
    B, V, E, H, T = 8, 80, 128, 128, 16

    key = jax.random.PRNGKey(0)
    k_param, k_x = jax.random.split(key)
    canon = init_canonical_params(k_param, V, E, H)
    kparams = pack_params(canon)

    x_seq = jax.random.randint(k_x, (T, B), 0, V, dtype=jnp.int32)
    hidden = jnp.zeros((1, B, H), jnp.float32)   # init_hidden
    cell = jnp.zeros((1, B, H), jnp.float32)

    # Fused multi-step path (weights read once for all T steps).
    fwd_seq = jax.jit(rnn_forward_seq, static_argnames=("vocab_size",))
    out_seq, h_new, c_new = fwd_seq(x_seq, hidden, cell, kparams, vocab_size=V)
    jax.block_until_ready((out_seq, h_new, c_new))

    out_ref, h_ref, c_ref = _reference_forward_seq(x_seq, hidden, cell, canon)
    assert out_seq.shape == (T, B, V)
    assert h_new.shape == (1, B, H) and c_new.shape == (1, B, H)
    assert jnp.allclose(out_seq, out_ref, atol=1e-2), float(jnp.max(jnp.abs(out_seq - out_ref)))
    assert jnp.allclose(h_new, h_ref, atol=5e-3), float(jnp.max(jnp.abs(h_new - h_ref)))
    assert jnp.allclose(c_new, c_ref, atol=5e-3), float(jnp.max(jnp.abs(c_new - c_ref)))

    # Single-step path: exact module forward(x, hidden, cell) signature.
    fwd1 = jax.jit(rnn_forward, static_argnames=("vocab_size",))
    out1, h1, c1 = fwd1(x_seq[0], hidden, cell, kparams, vocab_size=V)
    jax.block_until_ready((out1, h1, c1))
    out1_ref, h1_ref, c1_ref = _reference_forward_seq(x_seq[:1], hidden, cell, canon)
    assert out1.shape == (B, V) and h1.shape == (1, B, H) and c1.shape == (1, B, H)
    assert jnp.allclose(out1, out1_ref[0], atol=5e-3)
    assert jnp.allclose(h1, h1_ref, atol=2e-3)
    assert jnp.allclose(c1, c1_ref, atol=2e-3)

    print("KERNEL_OK")
</pallas_src>

<mosaic_0001>
module attributes {stable_mosaic.version = 11 : i64} {
  func.func @lstm_seq_kernel(%arg0: memref<128x1xi32, #tpu.memory_space<vmem>>, %arg1: memref<8x128xf32, #tpu.memory_space<vmem>>, %arg2: memref<8x128xf32, #tpu.memory_space<vmem>>, %arg3: memref<128x512xbf16, #tpu.memory_space<vmem>>, %arg4: memref<128x512xbf16, #tpu.memory_space<vmem>>, %arg5: memref<1x512xf32, #tpu.memory_space<vmem>>, %arg6: memref<128x128xbf16, #tpu.memory_space<vmem>>, %arg7: memref<1x128xf32, #tpu.memory_space<vmem>>, %arg8: memref<128x128xf32, #tpu.memory_space<vmem>>, %arg9: memref<8x128xf32, #tpu.memory_space<vmem>>, %arg10: memref<8x128xf32, #tpu.memory_space<vmem>>, %arg11: memref<128x512xf32, #tpu.memory_space<vmem>>) attributes {dimension_semantics = [], scalar_prefetch = 0 : i64, scratch_operands = 1 : i64, tpu.core_type = #tpu.core_type<tc>} {
    %0 = tpu.iota {dimensions = array<i32: 1>} : vector<128x128xi32>
    %c0 = arith.constant 0 : index
    %c0_0 = arith.constant 0 : index
    %1 = vector.load %arg0[%c0, %c0_0] : memref<128x1xi32, #tpu.memory_space<vmem>>, vector<128x1xi32>
    %2 = vector.broadcast %1 : vector<128x1xi32> to vector<128x128xi32>
    %3 = arith.cmpi eq, %0, %2 : vector<128x128xi32>
    %4 = arith.extui %3 : vector<128x128xi1> to vector<128x128xi32>
    %5 = arith.sitofp %4 : vector<128x128xi32> to vector<128x128xf32>
    %6 = arith.truncf %5 : vector<128x128xf32> to vector<128x128xbf16>
    %c0_1 = arith.constant 0 : index
    %c0_2 = arith.constant 0 : index
    %7 = vector.load %arg3[%c0_1, %c0_2] : memref<128x512xbf16, #tpu.memory_space<vmem>>, vector<128x512xbf16>
    %cst = arith.constant dense<0.000000e+00> : vector<128x512xf32>
    %8 = tpu.matmul %6, %7, %cst {dimension_numbers = #tpu.dot_dimension_numbers<[1], [0], [0], [1], [0, 0, 1, 1], [], []>} : vector<128x128xbf16>, vector<128x512xbf16>, vector<128x512xf32> -> vector<128x512xf32>
    %c0_3 = arith.constant 0 : index
    %c0_4 = arith.constant 0 : index
    %9 = vector.load %arg5[%c0_3, %c0_4] : memref<1x512xf32, #tpu.memory_space<vmem>>, vector<1x512xf32>
    %10 = vector.broadcast %9 : vector<1x512xf32> to vector<128x512xf32>
    %11 = arith.addf %8, %10 : vector<128x512xf32>
    %c0_5 = arith.constant 0 : index
    %c0_6 = arith.constant 0 : index
    %12 = vector.load %arg11[%c0_5, %c0_6] : memref<128x512xf32, #tpu.memory_space<vmem>>, vector<128x512xf32>
    tpu.vector_store %arg11[%c0_5, %c0_6], %11 {strides = array<i32>} : memref<128x512xf32, #tpu.memory_space<vmem>>, vector<128x512xf32>,
    %c0_7 = arith.constant 0 : index
    %c0_8 = arith.constant 0 : index
    %13 = vector.load %arg1[%c0_7, %c0_8] : memref<8x128xf32, #tpu.memory_space<vmem>>, vector<8x128xf32>
    %c0_9 = arith.constant 0 : index
    %c0_10 = arith.constant 0 : index
    %14 = vector.load %arg9[%c0_9, %c0_10] : memref<8x128xf32, #tpu.memory_space<vmem>>, vector<8x128xf32>
    tpu.vector_store %arg9[%c0_9, %c0_10], %13 {strides = array<i32>} : memref<8x128xf32, #tpu.memory_space<vmem>>, vector<8x128xf32>,
    %c0_11 = arith.constant 0 : index
    %c0_12 = arith.constant 0 : index
    %15 = vector.load %arg2[%c0_11, %c0_12] : memref<8x128xf32, #tpu.memory_space<vmem>>, vector<8x128xf32>
    %c0_13 = arith.constant 0 : index
    %c0_14 = arith.constant 0 : index
    %16 = vector.load %arg10[%c0_13, %c0_14] : memref<8x128xf32, #tpu.memory_space<vmem>>, vector<8x128xf32>
    tpu.vector_store %arg10[%c0_13, %c0_14], %15 {strides = array<i32>} : memref<8x128xf32, #tpu.memory_space<vmem>>, vector<8x128xf32>,
    %c0_i32 = arith.constant 0 : i32
    %c16_i32 = arith.constant 16 : i32
    %17 = arith.addi %c0_i32, %c16_i32 : i32
    %c1_i32 = arith.constant 1 : i32
    scf.for %arg12 = %c0_i32 to %17 step %c1_i32  : i32 {
      %c1_i32_16 = arith.constant 1 : i32
      %18 = arith.muli %arg12, %c1_i32_16 : i32
      %c0_i32_17 = arith.constant 0 : i32
      %19 = arith.addi %c0_i32_17, %18 : i32
      %c8_i32 = arith.constant 8 : i32
      %20 = arith.muli %19, %c8_i32 : i32
      %21 = tpu.assume_multiple %20, 8 : i32
      %22 = arith.index_cast %21 : i32 to index
      %c0_18 = arith.constant 0 : index
      %23 = vector.load %arg11[%22, %c0_18] : memref<128x512xf32, #tpu.memory_space<vmem>>, vector<8x512xf32>
      %c0_19 = arith.constant 0 : index
      %c0_20 = arith.constant 0 : index
      %24 = vector.load %arg9[%c0_19, %c0_20] : memref<8x128xf32, #tpu.memory_space<vmem>>, vector<8x128xf32>
      %25 = arith.truncf %24 : vector<8x128xf32> to vector<8x128xbf16>
      %c0_21 = arith.constant 0 : index
      %c0_22 = arith.constant 0 : index
      %26 = vector.load %arg4[%c0_21, %c0_22] : memref<128x512xbf16, #tpu.memory_space<vmem>>, vector<128x512xbf16>
      %cst_23 = arith.constant dense<0.000000e+00> : vector<8x512xf32>
      %27 = tpu.matmul %25, %26, %cst_23 {dimension_numbers = #tpu.dot_dimension_numbers<[1], [0], [0], [1], [0, 0, 1, 1], [], []>} : vector<8x128xbf16>, vector<128x512xbf16>, vector<8x512xf32> -> vector<8x512xf32>
      %28 = arith.addf %23, %27 : vector<8x512xf32>
      %29 = vector.extract_strided_slice %28 {offsets = [0, 0], sizes = [8, 384], strides = [1, 1]} : vector<8x512xf32> to vector<8x384xf32>
      %30 = arith.negf %29 : vector<8x384xf32>
      %31 = math.exp %30 : vector<8x384xf32>
      %cst_24 = arith.constant 1.000000e+00 : f32
      %32 = vector.broadcast %cst_24 : f32 to vector<8x384xf32>
      %33 = arith.addf %32, %31 : vector<8x384xf32>
      %34 = arith.divf %32, %33 : vector<8x384xf32>
      %35 = vector.extract_strided_slice %34 {offsets = [0, 0], sizes = [8, 128], strides = [1, 1]} : vector<8x384xf32> to vector<8x128xf32>
      %36 = vector.extract_strided_slice %34 {offsets = [0, 128], sizes = [8, 128], strides = [1, 1]} : vector<8x384xf32> to vector<8x128xf32>
      %37 = vector.extract_strided_slice %34 {offsets = [0, 256], sizes = [8, 128], strides = [1, 1]} : vector<8x384xf32> to vector<8x128xf32>
      %38 = vector.extract_strided_slice %28 {offsets = [0, 384], sizes = [8, 128], strides = [1, 1]} : vector<8x512xf32> to vector<8x128xf32>
      %39 = math.tanh %38 : vector<8x128xf32>
      %c0_25 = arith.constant 0 : index
      %c0_26 = arith.constant 0 : index
      %40 = vector.load %arg10[%c0_25, %c0_26] : memref<8x128xf32, #tpu.memory_space<vmem>>, vector<8x128xf32>
      %41 = arith.mulf %36, %40 : vector<8x128xf32>
      %42 = arith.mulf %35, %39 : vector<8x128xf32>
      %43 = arith.addf %41, %42 : vector<8x128xf32>
      %44 = math.tanh %43 : vector<8x128xf32>
      %45 = arith.mulf %37, %44 : vector<8x128xf32>
      %c0_27 = arith.constant 0 : index
      %c0_28 = arith.constant 0 : index
      %46 = vector.load %arg10[%c0_27, %c0_28] : memref<8x128xf32, #tpu.memory_space<vmem>>, vector<8x128xf32>
      tpu.vector_store %arg10[%c0_27, %c0_28], %43 {strides = array<i32>} : memref<8x128xf32, #tpu.memory_space<vmem>>, vector<8x128xf32>,
      %c0_29 = arith.constant 0 : index
      %c0_30 = arith.constant 0 : index
      %47 = vector.load %arg9[%c0_29, %c0_30] : memref<8x128xf32, #tpu.memory_space<vmem>>, vector<8x128xf32>
      tpu.vector_store %arg9[%c0_29, %c0_30], %45 {strides = array<i32>} : memref<8x128xf32, #tpu.memory_space<vmem>>, vector<8x128xf32>,
      %48 = arith.truncf %45 : vector<8x128xf32> to vector<8x128xbf16>
      %c0_31 = arith.constant 0 : index
      %c0_32 = arith.constant 0 : index
      %49 = vector.load %arg6[%c0_31, %c0_32] : memref<128x128xbf16, #tpu.memory_space<vmem>>, vector<128x128xbf16>
      %cst_33 = arith.constant dense<0.000000e+00> : vector<8x128xf32>
      %50 = tpu.matmul %48, %49, %cst_33 {dimension_numbers = #tpu.dot_dimension_numbers<[1], [0], [0], [1], [0, 0, 1, 1], [], []>} : vector<8x128xbf16>, vector<128x128xbf16>, vector<8x128xf32> -> vector<8x128xf32>
      %c0_34 = arith.constant 0 : index
      %c0_35 = arith.constant 0 : index
      %51 = vector.load %arg7[%c0_34, %c0_35] : memref<1x128xf32, #tpu.memory_space<vmem>>, vector<1x128xf32>
      %52 = vector.broadcast %51 : vector<1x128xf32> to vector<8x128xf32>
      %53 = arith.addf %50, %52 : vector<8x128xf32>
      %54 = arith.index_cast %21 : i32 to index
      %c0_36 = arith.constant 0 : index
      %55 = vector.load %arg8[%54, %c0_36] : memref<128x128xf32, #tpu.memory_space<vmem>>, vector<8x128xf32>
      tpu.vector_store %arg8[%54, %c0_36], %53 {strides = array<i32>} : memref<128x128xf32, #tpu.memory_space<vmem>>, vector<8x128xf32>,
    }
    %c16_i32_15 = arith.constant 16 : i32
    return
  }
}

</mosaic_0001>

<bundles_post_ra>
// kernel: rnn_forward_seq.1
= control target key start
LH: loop header
LB: loop body
LE: loop exit
PB: predicated region body
PF: predicated region fallthrough
CT: control target
= control target key end

     0   :  { %16 = vsyncpa [#allocation4], 0  ;;  %s1887_s0 = inlined_call_operand.vmem [shape: s32[128,1], index: 0, kind: input, shape index: {}]   ;;  %s1888_s1 = inlined_call_operand.vmem [shape: f32[8,128], index: 1, kind: input, shape index: {}, may-alias: {1,9}]   ;;  %s1889_s2 = inlined_call_operand.vmem [shape: f32[8,128], index: 2, kind: input, shape index: {}, may-alias: {2,10}]   ;;  %s1890_s3 = inlined_call_operand.hbm [shape: bf16[128,512], index: 3, kind: input, shape index: {}]   ;;  %s1891_s4 = inlined_call_operand.hbm [shape: bf16[128,512], index: 4, kind: input, shape index: {}]   ;;  %s1892_s5 = inlined_call_operand.vmem [shape: f32[1,512], index: 5, kind: input, shape index: {}]   ;;  %s1893_s6 = inlined_call_operand.vmem [shape: bf16[128,128], index: 6, kind: input, shape index: {}]   ;;  %s1894_s7 = inlined_call_operand.vmem [shape: f32[1,128], index: 7, kind: input, shape index: {}]   ;;  %s1895_s8 = inlined_call_operand.hbm [shape: f32[128,128], index: 8, kind: output, shape index: {0}]   ;;  %s1896_s9 = inlined_call_operand.vmem [shape: f32[8,128], index: 9, kind: output, shape index: {1}, may-alias: {1,9}]   ;;  %s1897_s10 = inlined_call_operand.vmem [shape: f32[8,128], index: 10, kind: output, shape index: {2}, may-alias: {2,10}]  }
   0x1   :  { %17 = vsyncpa [#allocation7], 0 }
   0x2   :  { %18 = vsyncpa [#allocation5], 0  ;;  %s1543_s13 = smov [#allocation3]   ;;  %s1463_s17 = scalar_lea.hbm %s1890_s3, 4096 }
   0x3   :  { %s30_s14 = sshll.u32 %s1543_s13, 4  ;;  %p1464_p0 = scmp.ne.s32.totalorder %s1890_s3, %s1463_s17  ;;  %s31_s14 = int_to_ptr.vmem [resolvable:$true] %s30_s14 }
   0x4   :  { %p1467_p1 = scmp.lt.u32.totalorder %s1463_s17, %s1890_s3 }
   0x6   :  { %p1469_p2 = pnand %p1467_p1, %p1464_p0 }
   0x8   :  { %1472 = shalt.err (!%p1469_p2)
}
   0x9   :  { %s1473_s22 = scalar_lea.vmem %s31_s14, 4096  ;;  %p1478_p4 = scmp.lt.s32.totalorder %s31_s14, %s31_s14 }
   0xa   :  { %p1474_p3 = scmp.ne.s32.totalorder %s31_s14, %s1473_s22  ;;  %p1479_p5 = scmp.lt.s32.totalorder %s1473_s22, %s1473_s22 }
   0xc   :  { %p1480_p6 = por %p1479_p5, %p1478_p4 }
   0xe   :  { %p1481_p7 = pnand %p1480_p6, %p1474_p3 }
  0x10   :  { %1484 = shalt.err (!%p1481_p7)
}
  0x11   :  { %s1544_s23 = smov 256   ;;  %s1545_s24 = smov 16  }
  0x12   :  { %36 = dma.hbm_to_vmem [thread:$0]  %s1890_s3, 4096, %s31_s14, [#allocation4], %s1544_s23, %s1544_s23, %s1545_s24  }
  0x13   :  { %s1546_s27 = smov [#allocation6]   ;;  %s1485_s11 = scalar_lea.hbm %s1891_s4, 4096 }
  0x14   :  { %s42_s28 = sshll.u32 %s1546_s27, 4  ;;  %p1486_p8 = scmp.ne.s32.totalorder %s1891_s4, %s1485_s11  ;;  %s43_s28 = int_to_ptr.vmem [resolvable:$true] %s42_s28 }
  0x15   :  { %p1489_p9 = scmp.lt.u32.totalorder %s1485_s11, %s1891_s4 }
  0x17   :  { %p1491_p10 = pnand %p1489_p9, %p1486_p8 }
  0x19   :  { %1494 = shalt.err (!%p1491_p10)
}
  0x1a   :  { %s1495_s17 = scalar_lea.vmem %s43_s28, 4096  ;;  %p1500_p12 = scmp.lt.s32.totalorder %s43_s28, %s43_s28 }
  0x1b   :  { %p1496_p11 = scmp.ne.s32.totalorder %s43_s28, %s1495_s17  ;;  %p1501_p13 = scmp.lt.s32.totalorder %s1495_s17, %s1495_s17 }
  0x1d   :  { %p1502_p0 = por %p1501_p13, %p1500_p12 }
  0x1f   :  { %p1503_p1 = pnand %p1502_p0, %p1496_p11 }
  0x21   :  { %1506 = shalt.err (!%p1503_p1)
}
  0x22   :  { %48 = dma.hbm_to_vmem [thread:$0]  %s1891_s4, 4096, %s43_s28, [#allocation7], %s1544_s23, %s1544_s23, %s1545_s24  }
  0x23   :  { %1533 = dma.done.wait [#allocation4], 4096  }
  0x24   :  { %1534 = vsyncadd [#allocation4], 4294963200 }
  0x25   :  { %1535 = dma.done.wait [#allocation7], 4096  }
  0x26   :  { %1536 = vsyncadd [#allocation7], 4294963200  ;;  %v1547_v0 = vmov 0   ;;  %v688_v1 = vld [vmem:[%s1888_s1] sm:$0xff]  ;;  %v66_v3 = vld [vmem:[%s1887_s0 + $0x10] sm:$0xff]  ;;  %v62_v51 = vlaneseq }
  0x27   :  { %1342 = vset.pattern.permute.xlu1 %v1547_v0  ;;  %1341 = vset.pattern.permute.xlu0 %v1547_v0  ;;  %v690_v2 = vld [vmem:[%s1889_s2] sm:$0xff]  ;;  %689 = vst [vmem:[%s1896_s9] sm:$0xff] %v688_v1  ;;  %v67_v5 = vld [vmem:[%s1887_s0 + $0x18] sm:$0xff]  ;;  %v65_v6 = vld [vmem:[%s1887_s0 + $0x8] sm:$0xff]  ;;  %v1548_v56 = vmov 1.0|1.0  }
  0x28   :  { %430 = vmatprep.mubr.bf16.mxu0 %v1547_v0  ;;  %543 = vmatprep.mubr.bf16.mxu1 %v1547_v0  ;;  %691 = vst [vmem:[%s1897_s10] sm:$0xff] %v690_v2  ;;  %v64_v4 = vld [vmem:[%s1887_s0] sm:$0xff]  ;;  %v69_v7 = vld [vmem:[%s1887_s0 + $0x28] sm:$0xff]  ;;  %v71_v11 = vld [vmem:[%s1887_s0 + $0x38] sm:$0xff]  ;;  %v1699_v53 = vand.u32 127, %v62_v51 }
  0x29   :  { %87 = vperm.xlu1 %1342, %v66_v3   ;;  %81 = vperm.xlu0 %1341, %v64_v4   ;;  %v68_v8 = vld [vmem:[%s1887_s0 + $0x20] sm:$0xff]  ;;  %v1345_v10 = vld [vmem:[#allocation3 + $0xc] ss:$16 sps:$4 sm:$0xff]   ;;  %v1348_v13 = vld [vmem:[#allocation3 + $0x8] ss:$16 sps:$4 sm:$0xff]  }
  0x2a   :  { %v1343_v9 = vld [vmem:[#allocation3 + $0x4] ss:$16 sps:$4 sm:$0xff]   ;;  %v1347_v12 = vld [vmem:[#allocation3] ss:$16 sps:$4 sm:$0xff]   ;;  %511 = vmatprep.subr.bf16.mxu1 %v1345_v10  ;;  %v1351_v16 = vld [vmem:[#allocation3 + $0x2c] ss:$16 sps:$4 sm:$0xff]  }
  0x2b   :  { %398 = vmatprep.subr.bf16.mxu0 %v1343_v9  ;;  %v70_v14 = vld [vmem:[%s1887_s0 + $0x30] sm:$0xff]  ;;  %512 = vmatpush1.bf16.msra.mxu1 %v1348_v13  ;;  %v1354_v18 = vld [vmem:[#allocation3 + $0x28] ss:$16 sps:$4 sm:$0xff]   ;;  %v72_v21 = vld [vmem:[%s1887_s0 + $0x40] sm:$0xff] }
  0x2c   :  { %v1349_v15 = vld [vmem:[#allocation3 + $0x24] ss:$16 sps:$4 sm:$0xff]   ;;  %399 = vmatpush1.bf16.msra.mxu0 %v1347_v12  ;;  %v1353_v17 = vld [vmem:[#allocation3 + $0x20] ss:$16 sps:$4 sm:$0xff]   ;;  %v73_v19 = vld [vmem:[%s1887_s0 + $0x48] sm:$0xff]  ;;  %513 = vmatprep.subr.bf16.mxu1 %v1351_v16 }
  0x2d   :  { %90 = vperm.xlu1 %1342, %v67_v5   ;;  %84 = vperm.xlu0 %1341, %v65_v6   ;;  %v1355_v20 = vld [vmem:[#allocation3 + $0x44] ss:$16 sps:$4 sm:$0xff]   ;;  %v1357_v22 = vld [vmem:[#allocation3 + $0x4c] ss:$16 sps:$4 sm:$0xff]   ;;  %v1359_v23 = vld [vmem:[#allocation3 + $0x40] ss:$16 sps:$4 sm:$0xff]  }
  0x2e   :  { %400 = vmatprep.subr.bf16.mxu0 %v1349_v15  ;;  %v1360_v24 = vld [vmem:[#allocation3 + $0x48] ss:$16 sps:$4 sm:$0xff]   ;;  %v1361_v25 = vld [vmem:[#allocation3 + $0x64] ss:$16 sps:$4 sm:$0xff]   ;;  %v1363_v27 = vld [vmem:[#allocation3 + $0x6c] ss:$16 sps:$4 sm:$0xff]  }
  0x2f   :  { %514 = vmatpush1.bf16.msra.mxu1 %v1354_v18  ;;  %v75_v26 = vld [vmem:[%s1887_s0 + $0x58] sm:$0xff]  ;;  %v74_v28 = vld [vmem:[%s1887_s0 + $0x50] sm:$0xff]  ;;  %v77_v33 = vld [vmem:[%s1887_s0 + $0x68] sm:$0xff] }
  0x30   :  { %401 = vmatpush1.bf16.msra.mxu0 %v1353_v17  ;;  %515 = vmatprep.subr.bf16.mxu1 %v1357_v22  ;;  %v1365_v29 = vld [vmem:[#allocation3 + $0x60] ss:$16 sps:$4 sm:$0xff]   ;;  %v1366_v30 = vld [vmem:[#allocation3 + $0x68] ss:$16 sps:$4 sm:$0xff]   ;;  %v1367_v31 = vld [vmem:[#allocation3 + $0x84] ss:$16 sps:$4 sm:$0xff]  }
  0x31   :  { %96 = vperm.xlu1 %1342, %v69_v7   ;;  %93 = vperm.xlu0 %1341, %v68_v8   ;;  %v1369_v32 = vld [vmem:[#allocation3 + $0x8c] ss:$16 sps:$4 sm:$0xff]   ;;  %v76_v34 = vld [vmem:[%s1887_s0 + $0x60] sm:$0xff]  ;;  %v1372_v36 = vld [vmem:[#allocation3 + $0x88] ss:$16 sps:$4 sm:$0xff]   ;;  %v219_v7 = vshrl.u32 %v62_v51, 7 }
  0x32   :  { %402 = vmatprep.subr.bf16.mxu0 %v1355_v20  ;;  %v1371_v35 = vld [vmem:[#allocation3 + $0x80] ss:$16 sps:$4 sm:$0xff]   ;;  %v1373_v37 = vld [vmem:[#allocation3 + $0xa4] ss:$16 sps:$4 sm:$0xff]   ;;  %v1375_v38 = vld [vmem:[#allocation3 + $0xac] ss:$16 sps:$4 sm:$0xff]  }
  0x33   :  { %516 = vmatpush1.bf16.msra.mxu1 %v1360_v24  ;;  %v79_v39 = vld [vmem:[%s1887_s0 + $0x78] sm:$0xff]  ;;  %v1377_v40 = vld [vmem:[#allocation3 + $0xa0] ss:$16 sps:$4 sm:$0xff]   ;;  %v1379_v43 = vld [vmem:[#allocation3 + $0xc4] ss:$16 sps:$4 sm:$0xff]   ;;  %v220_v8 = vsub.s32 0, %v219_v7 }
  0x34   :  { %403 = vmatpush1.bf16.msra.mxu0 %v1359_v23  ;;  %517 = vmatprep.subr.bf16.mxu1 %v1363_v27  ;;  %v78_v41 = vld [vmem:[%s1887_s0 + $0x70] sm:$0xff]  ;;  %v1378_v42 = vld [vmem:[#allocation3 + $0xa8] ss:$16 sps:$4 sm:$0xff]   ;;  %v1381_v44 = vld [vmem:[#allocation3 + $0xcc] ss:$16 sps:$4 sm:$0xff]   ;;  %v228_v9 = vsub.s32 2, %v219_v7 }
  0x35   :  { %102 = vperm.xlu1 %1342, %v71_v11   ;;  %99 = vperm.xlu0 %1341, %v70_v14   ;;  %v1383_v45 = vld [vmem:[#allocation3 + $0xc0] ss:$16 sps:$4 sm:$0xff]   ;;  %v1384_v46 = vld [vmem:[#allocation3 + $0xc8] ss:$16 sps:$4 sm:$0xff]   ;;  %v1385_v47 = vld [vmem:[#allocation3 + $0xe4] ss:$16 sps:$4 sm:$0xff]  }
  0x36   :  { %404 = vmatprep.subr.bf16.mxu0 %v1361_v25  ;;  %v1387_v48 = vld [vmem:[#allocation3 + $0xec] ss:$16 sps:$4 sm:$0xff]   ;;  %v1389_v49 = vld [vmem:[#allocation3 + $0xe0] ss:$16 sps:$4 sm:$0xff]   ;;  %v1390_v50 = vld [vmem:[#allocation3 + $0xe8] ss:$16 sps:$4 sm:$0xff]  }
  0x37   :  { %518 = vmatpush1.bf16.msra.mxu1 %v1366_v30  ;;  %v216_v10 = vld [vmem:[%s1892_s5] sm:$0xf]  ;;  %v224_v11 = vsub.s32 1, %v219_v7  ;;  %v232_v12 = vsub.s32 3, %v219_v7  ;;  %s1823_s5 = smov 0  }
  0x38   :  { %405 = vmatpush1.bf16.msra.mxu0 %v1365_v29  ;;  %519 = vmatprep.subr.bf16.mxu1 %v1369_v32  ;;  %v1753_v13 = vrot.slane %v216_v10, %v228_v9 }
  0x39   :  { %108 = vperm.xlu1 %1342, %v73_v19   ;;  %105 = vperm.xlu0 %1341, %v72_v21   ;;  %v1755_v14 = vrot.slane %v216_v10, %v224_v11  ;;  %v1757_v15 = vrot.slane %v216_v10, %v232_v12 }
  0x3a   :  { %406 = vmatprep.subr.bf16.mxu0 %v1367_v31 }
  0x3b   :  { %520 = vmatpush1.bf16.msra.mxu1 %v1372_v36 }
  0x3c   :  { %407 = vmatpush1.bf16.msra.mxu0 %v1371_v35  ;;  %521 = vmatprep.subr.bf16.mxu1 %v1375_v38 }
  0x3d   :  { %114 = vperm.xlu1 %1342, %v75_v26   ;;  %111 = vperm.xlu0 %1341, %v74_v28  }
  0x3e   :  { %408 = vmatprep.subr.bf16.mxu0 %v1373_v37 }
  0x3f   :  { %522 = vmatpush1.bf16.msra.mxu1 %v1378_v42 }
  0x40   :  { %409 = vmatpush1.bf16.msra.mxu0 %v1377_v40  ;;  %523 = vmatprep.subr.bf16.mxu1 %v1381_v44 }
  0x41   :  { %120 = vperm.xlu1 %1342, %v77_v33   ;;  %117 = vperm.xlu0 %1341, %v76_v34  }
  0x42   :  { %410 = vmatprep.subr.bf16.mxu0 %v1379_v43 }
  0x43   :  { %524 = vmatpush1.bf16.msra.mxu1 %v1384_v46 }
  0x44   :  { %411 = vmatpush1.bf16.msra.mxu0 %v1383_v45  ;;  %525 = vmatprep.subr.bf16.mxu1 %v1387_v48 }
  0x45   :  { %126 = vperm.xlu1 %1342, %v79_v39   ;;  %123 = vperm.xlu0 %1341, %v78_v41  }
  0x46   :  { %412 = vmatprep.subr.bf16.mxu0 %v1385_v47 }
  0x47   :  { %526 = vmatpush1.bf16.msra.mxu1 %v1390_v50 }
  0x48   :  { %413 = vmatpush1.bf16.msra.mxu0 %v1389_v49 }
  0xa8   :  { %v82_v52 = vpop.permute.xlu0 %81  ;;  %v88_v54 = vpop.permute.xlu1 %87 }
  0xa9   :  { %vm128_vm0 = vcmp.eq.s32.totalorder %v1699_v53, %v82_v52  ;;  %vm130_vm3 = vcmp.eq.s32.totalorder %v1699_v53, %v88_v54 }
  0xac   :  { %v85_v55 = vpop.permute.xlu0 %84  ;;  %v91_v57 = vpop.permute.xlu1 %90 }
  0xad   :  { %vm129_vm1 = vcmp.eq.s32.totalorder %v1699_v53, %v85_v55  ;;  %vm131_vm4 = vcmp.eq.s32.totalorder %v1699_v53, %v91_v57 }
  0xae   :  { %vm1212_vm2 = vmpackc.low %vm129_vm1, %vm128_vm0 }
  0xaf   :  { %1213 = vmatmul.mubr.msk.bf16.vlgmr.msra.gmra.mrb[0].mxu0 %vm1212_vm2, %v1548_v56  ;;  %1229 = vmatmul.mubr.msk.bf16.vlgmr.msra.gmra.mrb[0].mxu1 %vm1212_vm2, %v1548_v56  ;;  %vm1214_vm5 = vmpackc.low %vm131_vm4, %vm130_vm3 }
  0xb0   :  { %440 = vmatprep.mubr.bf16.mxu0 %v1547_v0  ;;  %553 = vmatprep.mubr.bf16.mxu1 %v1547_v0  ;;  %v97_v58 = vpop.permute.xlu1 %96  ;;  %v94_v59 = vpop.permute.xlu0 %93 }
  0xb1   :  { %vm133_vm6 = vcmp.eq.s32.totalorder %v1699_v53, %v97_v58  ;;  %vm132_vm7 = vcmp.eq.s32.totalorder %v1699_v53, %v94_v59 }
  0xb2   :  { %vm1216_vm8 = vmpackc.low %vm133_vm6, %vm132_vm7 }
  0xb4   :  { %v103_v60 = vpop.permute.xlu1 %102  ;;  %v100_v61 = vpop.permute.xlu0 %99 }
  0xb5   :  { %vm135_vm9 = vcmp.eq.s32.totalorder %v1699_v53, %v103_v60  ;;  %vm134_vm10 = vcmp.eq.s32.totalorder %v1699_v53, %v100_v61 }
  0xb6   :  { %vm1218_vm11 = vmpackc.low %vm135_vm9, %vm134_vm10 }
  0xb7   :  { %1215 = vmatmul.mubr.msk.bf16.gmra.mrb[4].mxu0 %vm1214_vm5, %v1548_v56  ;;  %1231 = vmatmul.mubr.msk.bf16.gmra.mrb[4].mxu1 %vm1214_vm5, %v1548_v56 }
  0xb8   :  { %450 = vmatprep.mubr.bf16.mxu0 %v1547_v0  ;;  %563 = vmatprep.mubr.bf16.mxu1 %v1547_v0  ;;  %v109_v62 = vpop.permute.xlu1 %108  ;;  %v106_v63 = vpop.permute.xlu0 %105 }
  0xb9   :  { %vm137_vm12 = vcmp.eq.s32.totalorder %v1699_v53, %v109_v62  ;;  %vm136_vm13 = vcmp.eq.s32.totalorder %v1699_v53, %v106_v63 }
  0xba   :  { %vm1220_vm14 = vmpackc.low %vm137_vm12, %vm136_vm13 }
  0xbc   :  { %v115_v1 = vpop.permute.xlu1 %114  ;;  %v112_v2 = vpop.permute.xlu0 %111 }
  0xbd   :  { %vm139_vm15 = vcmp.eq.s32.totalorder %v1699_v53, %v115_v1  ;;  %vm138_vm0 = vcmp.eq.s32.totalorder %v1699_v53, %v112_v2 }
  0xbe   :  { %vm1222_vm1 = vmpackc.low %vm139_vm15, %vm138_vm0 }
  0xbf   :  { %1217 = vmatmul.mubr.msk.bf16.gmra.mrb[8].mxu0 %vm1216_vm8, %v1548_v56  ;;  %1233 = vmatmul.mubr.msk.bf16.gmra.mrb[8].mxu1 %vm1216_vm8, %v1548_v56 }
  0xc0   :  { %460 = vmatprep.mubr.bf16.mxu0 %v1547_v0  ;;  %573 = vmatprep.mubr.bf16.mxu1 %v1547_v0  ;;  %v121_v3 = vpop.permute.xlu1 %120  ;;  %v118_v4 = vpop.permute.xlu0 %117 }
  0xc1   :  { %vm141_vm2 = vcmp.eq.s32.totalorder %v1699_v53, %v121_v3  ;;  %vm140_vm3 = vcmp.eq.s32.totalorder %v1699_v53, %v118_v4 }
  0xc2   :  { %vm1224_vm4 = vmpackc.low %vm141_vm2, %vm140_vm3 }
  0xc4   :  { %v127_v5 = vpop.permute.xlu1 %126  ;;  %v124_v6 = vpop.permute.xlu0 %123 }
  0xc5   :  { %vm143_vm5 = vcmp.eq.s32.totalorder %v1699_v53, %v127_v5  ;;  %vm142_vm6 = vcmp.eq.s32.totalorder %v1699_v53, %v124_v6 }
  0xc6   :  { %vm1226_vm7 = vmpackc.low %vm143_vm5, %vm142_vm6 }
  0xc7   :  { %1219 = vmatmul.mubr.msk.bf16.gmra.mrb[12].mxu0 %vm1218_vm11, %v1548_v56  ;;  %1235 = vmatmul.mubr.msk.bf16.gmra.mrb[12].mxu1 %vm1218_vm11, %v1548_v56 }
  0xc8   :  { %470 = vmatprep.mubr.bf16.mxu0 %v1547_v0  ;;  %583 = vmatprep.mubr.bf16.mxu1 %v1547_v0 }
  0xcf   :  { %1221 = vmatmul.mubr.msk.bf16.gmra.mrb[16].mxu0 %vm1220_vm14, %v1548_v56  ;;  %1237 = vmatmul.mubr.msk.bf16.gmra.mrb[16].mxu1 %vm1220_vm14, %v1548_v56 }
  0xd0   :  { %480 = vmatprep.mubr.bf16.mxu0 %v1547_v0  ;;  %593 = vmatprep.mubr.bf16.mxu1 %v1547_v0 }
  0xd7   :  { %1223 = vmatmul.mubr.msk.bf16.gmra.mrb[20].mxu0 %vm1222_vm1, %v1548_v56  ;;  %1239 = vmatmul.mubr.msk.bf16.gmra.mrb[20].mxu1 %vm1222_vm1, %v1548_v56 }
  0xd8   :  { %490 = vmatprep.mubr.bf16.mxu0 %v1547_v0  ;;  %603 = vmatprep.mubr.bf16.mxu1 %v1547_v0 }
  0xdf   :  { %1225 = vmatmul.mubr.msk.bf16.gmra.mrb[24].mxu0 %vm1224_vm4, %v1548_v56  ;;  %1241 = vmatmul.mubr.msk.bf16.gmra.mrb[24].mxu1 %vm1224_vm4, %v1548_v56 }
  0xe0   :  { %500 = vmatprep.mubr.bf16.mxu0 %v1547_v0  ;;  %613 = vmatprep.mubr.bf16.mxu1 %v1547_v0  ;;  %v1751_v0 = vrot.slane %v216_v10, %v220_v8 }
  0xe7   :  { %1227 = vmatmul.mubr.msk.bf16.gmra.mrb[28].mxu0 %vm1226_vm7, %v1548_v56  ;;  %1243 = vmatmul.mubr.msk.bf16.gmra.mrb[28].mxu1 %vm1226_vm7, %v1548_v56 }
 0x182   :  { %v432_v16 = vpop.f32.mrb[0].mxu0  ;;  %v545_v17 = vpop.f32.mrb[0].mxu1 }
 0x183   :  { %v433_v18 = vadd.f32 %v432_v16, %v1751_v0  ;;  %v546_v19 = vadd.f32 %v545_v17, %v1753_v13  ;;  %v434_v20 = vpop.f32.mrb[1].mxu0  ;;  %v547_v21 = vpop.f32.mrb[1].mxu1 }
 0x184   :  { %v435_v22 = vadd.f32 %v434_v20, %v1755_v14  ;;  %v548_v23 = vadd.f32 %v547_v21, %v1757_v15  ;;  %v436_v24 = vpop.f32.mrb[2].mxu0  ;;  %v549_v25 = vpop.f32.mrb[2].mxu1 }
 0x185   :  { %624 = vst [vmem:[#allocation2] sm:$0xff] %v433_v18  ;;  %626 = vst [vmem:[#allocation2 + $0x10] sm:$0xff] %v546_v19  ;;  %v437_v26 = vadd.f32 %v436_v24, %v1751_v0  ;;  %v550_v27 = vadd.f32 %v549_v25, %v1753_v13  ;;  %v438_v28 = vpop.f32.mrb[3].mxu0  ;;  %v551_v29 = vpop.f32.mrb[3].mxu1 }
 0x186   :  { %625 = vst [vmem:[#allocation2 + $0x8] sm:$0xff] %v435_v22  ;;  %627 = vst [vmem:[#allocation2 + $0x18] sm:$0xff] %v548_v23  ;;  %v439_v30 = vadd.f32 %v438_v28, %v1755_v14  ;;  %v552_v31 = vadd.f32 %v551_v29, %v1757_v15 }
 0x187   :  { %628 = vst [vmem:[#allocation2 + $0x20] sm:$0xff] %v437_v26  ;;  %630 = vst [vmem:[#allocation2 + $0x30] sm:$0xff] %v550_v27 }
 0x188   :  { %629 = vst [vmem:[#allocation2 + $0x28] sm:$0xff] %v439_v30  ;;  %631 = vst [vmem:[#allocation2 + $0x38] sm:$0xff] %v552_v31 }
 0x18a   :  { %v442_v32 = vpop.f32.mrb[4].mxu0  ;;  %v555_v33 = vpop.f32.mrb[4].mxu1 }
 0x18b   :  { %v443_v34 = vadd.f32 %v442_v32, %v1751_v0  ;;  %v556_v35 = vadd.f32 %v555_v33, %v1753_v13  ;;  %v444_v36 = vpop.f32.mrb[5].mxu0  ;;  %v557_v37 = vpop.f32.mrb[5].mxu1 }
 0x18c   :  { %v445_v38 = vadd.f32 %v444_v36, %v1755_v14  ;;  %v558_v39 = vadd.f32 %v557_v37, %v1757_v15  ;;  %v446_v40 = vpop.f32.mrb[6].mxu0  ;;  %v559_v41 = vpop.f32.mrb[6].mxu1 }
 0x18d   :  { %632 = vst [vmem:[#allocation2 + $0x40] sm:$0xff] %v443_v34  ;;  %634 = vst [vmem:[#allocation2 + $0x50] sm:$0xff] %v556_v35  ;;  %v447_v42 = vadd.f32 %v446_v40, %v1751_v0  ;;  %v560_v43 = vadd.f32 %v559_v41, %v1753_v13  ;;  %v448_v44 = vpop.f32.mrb[7].mxu0  ;;  %v561_v45 = vpop.f32.mrb[7].mxu1 }
 0x18e   :  { %633 = vst [vmem:[#allocation2 + $0x48] sm:$0xff] %v445_v38  ;;  %635 = vst [vmem:[#allocation2 + $0x58] sm:$0xff] %v558_v39  ;;  %v449_v46 = vadd.f32 %v448_v44, %v1755_v14  ;;  %v562_v47 = vadd.f32 %v561_v45, %v1757_v15 }
 0x18f   :  { %636 = vst [vmem:[#allocation2 + $0x60] sm:$0xff] %v447_v42  ;;  %638 = vst [vmem:[#allocation2 + $0x70] sm:$0xff] %v560_v43 }
 0x190   :  { %637 = vst [vmem:[#allocation2 + $0x68] sm:$0xff] %v449_v46  ;;  %639 = vst [vmem:[#allocation2 + $0x78] sm:$0xff] %v562_v47 }
 0x192   :  { %v452_v48 = vpop.f32.mrb[8].mxu0  ;;  %v565_v49 = vpop.f32.mrb[8].mxu1 }
 0x193   :  { %v453_v50 = vadd.f32 %v452_v48, %v1751_v0  ;;  %v566_v51 = vadd.f32 %v565_v49, %v1753_v13  ;;  %v454_v52 = vpop.f32.mrb[9].mxu0  ;;  %v567_v53 = vpop.f32.mrb[9].mxu1 }
 0x194   :  { %v455_v54 = vadd.f32 %v454_v52, %v1755_v14  ;;  %v568_v55 = vadd.f32 %v567_v53, %v1757_v15  ;;  %v456_v56 = vpop.f32.mrb[10].mxu0  ;;  %v569_v57 = vpop.f32.mrb[10].mxu1 }
 0x195   :  { %640 = vst [vmem:[#allocation2 + $0x80] sm:$0xff] %v453_v50  ;;  %642 = vst [vmem:[#allocation2 + $0x90] sm:$0xff] %v566_v51  ;;  %v457_v58 = vadd.f32 %v456_v56, %v1751_v0  ;;  %v570_v59 = vadd.f32 %v569_v57, %v1753_v13  ;;  %v458_v60 = vpop.f32.mrb[11].mxu0  ;;  %v571_v61 = vpop.f32.mrb[11].mxu1 }
 0x196   :  { %641 = vst [vmem:[#allocation2 + $0x88] sm:$0xff] %v455_v54  ;;  %643 = vst [vmem:[#allocation2 + $0x98] sm:$0xff] %v568_v55  ;;  %v459_v62 = vadd.f32 %v458_v60, %v1755_v14  ;;  %v572_v63 = vadd.f32 %v571_v61, %v1757_v15 }
 0x197   :  { %644 = vst [vmem:[#allocation2 + $0xa0] sm:$0xff] %v457_v58  ;;  %646 = vst [vmem:[#allocation2 + $0xb0] sm:$0xff] %v570_v59 }
 0x198   :  { %645 = vst [vmem:[#allocation2 + $0xa8] sm:$0xff] %v459_v62  ;;  %647 = vst [vmem:[#allocation2 + $0xb8] sm:$0xff] %v572_v63 }
 0x19a   :  { %v462_v1 = vpop.f32.mrb[12].mxu0  ;;  %v575_v2 = vpop.f32.mrb[12].mxu1 }
 0x19b   :  { %v463_v3 = vadd.f32 %v462_v1, %v1751_v0  ;;  %v576_v4 = vadd.f32 %v575_v2, %v1753_v13  ;;  %v464_v5 = vpop.f32.mrb[13].mxu0  ;;  %v577_v6 = vpop.f32.mrb[13].mxu1 }
 0x19c   :  { %v465_v7 = vadd.f32 %v464_v5, %v1755_v14  ;;  %v578_v8 = vadd.f32 %v577_v6, %v1757_v15  ;;  %v466_v9 = vpop.f32.mrb[14].mxu0  ;;  %v579_v10 = vpop.f32.mrb[14].mxu1 }
 0x19d   :  { %648 = vst [vmem:[#allocation2 + $0xc0] sm:$0xff] %v463_v3  ;;  %650 = vst [vmem:[#allocation2 + $0xd0] sm:$0xff] %v576_v4  ;;  %v467_v11 = vadd.f32 %v466_v9, %v1751_v0  ;;  %v580_v12 = vadd.f32 %v579_v10, %v1753_v13  ;;  %v468_v16 = vpop.f32.mrb[15].mxu0  ;;  %v581_v17 = vpop.f32.mrb[15].mxu1 }
 0x19e   :  { %649 = vst [vmem:[#allocation2 + $0xc8] sm:$0xff] %v465_v7  ;;  %651 = vst [vmem:[#allocation2 + $0xd8] sm:$0xff] %v578_v8  ;;  %v469_v18 = vadd.f32 %v468_v16, %v1755_v14  ;;  %v582_v19 = vadd.f32 %v581_v17, %v1757_v15 }
 0x19f   :  { %652 = vst [vmem:[#allocation2 + $0xe0] sm:$0xff] %v467_v11  ;;  %654 = vst [vmem:[#allocation2 + $0xf0] sm:$0xff] %v580_v12 }
 0x1a0   :  { %653 = vst [vmem:[#allocation2 + $0xe8] sm:$0xff] %v469_v18  ;;  %655 = vst [vmem:[#allocation2 + $0xf8] sm:$0xff] %v582_v19 }
 0x1a2   :  { %v472_v20 = vpop.f32.mrb[16].mxu0  ;;  %v585_v21 = vpop.f32.mrb[16].mxu1 }
 0x1a3   :  { %v473_v22 = vadd.f32 %v472_v20, %v1751_v0  ;;  %v586_v23 = vadd.f32 %v585_v21, %v1753_v13  ;;  %v474_v24 = vpop.f32.mrb[17].mxu0  ;;  %v587_v25 = vpop.f32.mrb[17].mxu1 }
 0x1a4   :  { %v475_v26 = vadd.f32 %v474_v24, %v1755_v14  ;;  %v588_v27 = vadd.f32 %v587_v25, %v1757_v15  ;;  %v476_v28 = vpop.f32.mrb[18].mxu0  ;;  %v589_v29 = vpop.f32.mrb[18].mxu1 }
 0x1a5   :  { %656 = vst [vmem:[#allocation2 + $0x100] sm:$0xff] %v473_v22  ;;  %658 = vst [vmem:[#allocation2 + $0x110] sm:$0xff] %v586_v23  ;;  %v477_v30 = vadd.f32 %v476_v28, %v1751_v0  ;;  %v590_v31 = vadd.f32 %v589_v29, %v1753_v13  ;;  %v478_v32 = vpop.f32.mrb[19].mxu0  ;;  %v591_v33 = vpop.f32.mrb[19].mxu1 }
 0x1a6   :  { %657 = vst [vmem:[#allocation2 + $0x108] sm:$0xff] %v475_v26  ;;  %659 = vst [vmem:[#allocation2 + $0x118] sm:$0xff] %v588_v27  ;;  %v479_v34 = vadd.f32 %v478_v32, %v1755_v14  ;;  %v592_v35 = vadd.f32 %v591_v33, %v1757_v15 }
 0x1a7   :  { %660 = vst [vmem:[#allocation2 + $0x120] sm:$0xff] %v477_v30  ;;  %662 = vst [vmem:[#allocation2 + $0x130] sm:$0xff] %v590_v31 }
 0x1a8   :  { %661 = vst [vmem:[#allocation2 + $0x128] sm:$0xff] %v479_v34  ;;  %663 = vst [vmem:[#allocation2 + $0x138] sm:$0xff] %v592_v35 }
 0x1aa   :  { %v482_v36 = vpop.f32.mrb[20].mxu0  ;;  %v595_v37 = vpop.f32.mrb[20].mxu1 }
 0x1ab   :  { %v483_v38 = vadd.f32 %v482_v36, %v1751_v0  ;;  %v596_v39 = vadd.f32 %v595_v37, %v1753_v13  ;;  %v484_v40 = vpop.f32.mrb[21].mxu0  ;;  %v597_v41 = vpop.f32.mrb[21].mxu1 }
 0x1ac   :  { %v485_v42 = vadd.f32 %v484_v40, %v1755_v14  ;;  %v598_v43 = vadd.f32 %v597_v41, %v1757_v15  ;;  %v486_v44 = vpop.f32.mrb[22].mxu0  ;;  %v599_v45 = vpop.f32.mrb[22].mxu1 }
 0x1ad   :  { %664 = vst [vmem:[#allocation2 + $0x140] sm:$0xff] %v483_v38  ;;  %666 = vst [vmem:[#allocation2 + $0x150] sm:$0xff] %v596_v39  ;;  %v487_v46 = vadd.f32 %v486_v44, %v1751_v0  ;;  %v600_v47 = vadd.f32 %v599_v45, %v1753_v13  ;;  %v488_v48 = vpop.f32.mrb[23].mxu0  ;;  %v601_v49 = vpop.f32.mrb[23].mxu1 }
 0x1ae   :  { %665 = vst [vmem:[#allocation2 + $0x148] sm:$0xff] %v485_v42  ;;  %667 = vst [vmem:[#allocation2 + $0x158] sm:$0xff] %v598_v43  ;;  %v489_v50 = vadd.f32 %v488_v48, %v1755_v14  ;;  %v602_v51 = vadd.f32 %v601_v49, %v1757_v15 }
 0x1af   :  { %668 = vst [vmem:[#allocation2 + $0x160] sm:$0xff] %v487_v46  ;;  %670 = vst [vmem:[#allocation2 + $0x170] sm:$0xff] %v600_v47 }
 0x1b0   :  { %669 = vst [vmem:[#allocation2 + $0x168] sm:$0xff] %v489_v50  ;;  %671 = vst [vmem:[#allocation2 + $0x178] sm:$0xff] %v602_v51 }
 0x1b2   :  { %v492_v52 = vpop.f32.mrb[24].mxu0  ;;  %v605_v53 = vpop.f32.mrb[24].mxu1 }
 0x1b3   :  { %v493_v54 = vadd.f32 %v492_v52, %v1751_v0  ;;  %v606_v55 = vadd.f32 %v605_v53, %v1753_v13  ;;  %v494_v56 = vpop.f32.mrb[25].mxu0  ;;  %v607_v57 = vpop.f32.mrb[25].mxu1 }
 0x1b4   :  { %v495_v58 = vadd.f32 %v494_v56, %v1755_v14  ;;  %v608_v59 = vadd.f32 %v607_v57, %v1757_v15  ;;  %v496_v60 = vpop.f32.mrb[26].mxu0  ;;  %v609_v61 = vpop.f32.mrb[26].mxu1 }
 0x1b5   :  { %672 = vst [vmem:[#allocation2 + $0x180] sm:$0xff] %v493_v54  ;;  %674 = vst [vmem:[#allocation2 + $0x190] sm:$0xff] %v606_v55  ;;  %v497_v62 = vadd.f32 %v496_v60, %v1751_v0  ;;  %v610_v63 = vadd.f32 %v609_v61, %v1753_v13  ;;  %v498_v1 = vpop.f32.mrb[27].mxu0  ;;  %v611_v2 = vpop.f32.mrb[27].mxu1 }
 0x1b6   :  { %673 = vst [vmem:[#allocation2 + $0x188] sm:$0xff] %v495_v58  ;;  %675 = vst [vmem:[#allocation2 + $0x198] sm:$0xff] %v608_v59  ;;  %v499_v3 = vadd.f32 %v498_v1, %v1755_v14  ;;  %v612_v4 = vadd.f32 %v611_v2, %v1757_v15 }
 0x1b7   :  { %676 = vst [vmem:[#allocation2 + $0x1a0] sm:$0xff] %v497_v62  ;;  %678 = vst [vmem:[#allocation2 + $0x1b0] sm:$0xff] %v610_v63 }
 0x1b8   :  { %677 = vst [vmem:[#allocation2 + $0x1a8] sm:$0xff] %v499_v3  ;;  %679 = vst [vmem:[#allocation2 + $0x1b8] sm:$0xff] %v612_v4 }
 0x1ba   :  { %v502_v5 = vpop.f32.mrb[28].mxu0  ;;  %v615_v6 = vpop.f32.mrb[28].mxu1 }
 0x1bb   :  { %v503_v7 = vadd.f32 %v502_v5, %v1751_v0  ;;  %v616_v8 = vadd.f32 %v615_v6, %v1753_v13  ;;  %v504_v9 = vpop.f32.mrb[29].mxu0  ;;  %v617_v10 = vpop.f32.mrb[29].mxu1 }
 0x1bc   :  { %v505_v11 = vadd.f32 %v504_v9, %v1755_v14  ;;  %v618_v12 = vadd.f32 %v617_v10, %v1757_v15  ;;  %v506_v16 = vpop.f32.mrb[30].mxu0  ;;  %v619_v17 = vpop.f32.mrb[30].mxu1 }
 0x1bd   :  { %680 = vst [vmem:[#allocation2 + $0x1c0] sm:$0xff] %v503_v7  ;;  %682 = vst [vmem:[#allocation2 + $0x1d0] sm:$0xff] %v616_v8  ;;  %v507_v18 = vadd.f32 %v506_v16, %v1751_v0  ;;  %v620_v19 = vadd.f32 %v619_v17, %v1753_v13  ;;  %v508_v20 = vpop.f32.mrb[31].mxu0  ;;  %v621_v21 = vpop.f32.mrb[31].mxu1 }
 0x1be   :  { %681 = vst [vmem:[#allocation2 + $0x1c8] sm:$0xff] %v505_v11  ;;  %683 = vst [vmem:[#allocation2 + $0x1d8] sm:$0xff] %v618_v12  ;;  %v509_v22 = vadd.f32 %v508_v20, %v1755_v14  ;;  %v622_v23 = vadd.f32 %v621_v21, %v1757_v15 }
 0x1bf   :  { %684 = vst [vmem:[#allocation2 + $0x1e0] sm:$0xff] %v507_v18  ;;  %686 = vst [vmem:[#allocation2 + $0x1f0] sm:$0xff] %v620_v19 }
 0x1c0   :  { %685 = vst [vmem:[#allocation2 + $0x1e8] sm:$0xff] %v509_v22  ;;  %687 = vst [vmem:[#allocation2 + $0x1f8] sm:$0xff] %v622_v23 }
 0x1c1 LB: > { %v1391_v0 = vld [vmem:[#allocation6 + $0x4] ss:$16 sps:$4 sm:$0xff]   ;;  %v1393_v13 = vld [vmem:[#allocation6] ss:$16 sps:$4 sm:$0xff]   ;;  %v1549_v24 = vmov 0   ;;  %v1550_v56 = vmov 0.0   ;;  %s1541_s5 = sphi %s1823_s5, %s697_s5  }
 0x1c2   : > { %934 = vmatprep.mubr.bf16.mxu0 %v1549_v24  ;;  %975 = vmatprep.mubr.bf16.mxu1 %v1549_v24  ;;  %v1394_v14 = vld [vmem:[#allocation6 + $0x24] ss:$16 sps:$4 sm:$0xff]   ;;  %v1396_v15 = vld [vmem:[#allocation6 + $0x20] ss:$16 sps:$4 sm:$0xff]   ;;  %v1402_v26 = vld [vmem:[#allocation6 + $0xc] ss:$16 sps:$4 sm:$0xff]  }
 0x1c3   : > { %902 = vmatprep.subr.bf16.mxu0 %v1391_v0  ;;  %v1397_v25 = vld [vmem:[#allocation6 + $0x44] ss:$16 sps:$4 sm:$0xff]   ;;  %v1405_v27 = vld [vmem:[#allocation6 + $0x8] ss:$16 sps:$4 sm:$0xff]   ;;  %v1399_v28 = vld [vmem:[#allocation6 + $0x40] ss:$16 sps:$4 sm:$0xff]   ;;  %943 = vmatprep.subr.bf16.mxu1 %v1402_v26 }
 0x1c4   : > { %903 = vmatpush1.bf16.msra.mxu0 %v1393_v13  ;;  %v1400_v29 = vld [vmem:[#allocation6 + $0x64] ss:$16 sps:$4 sm:$0xff]   ;;  %944 = vmatpush1.bf16.msra.mxu1 %v1405_v27  ;;  %v1408_v30 = vld [vmem:[#allocation6 + $0x2c] ss:$16 sps:$4 sm:$0xff]   ;;  %v1411_v31 = vld [vmem:[#allocation6 + $0x28] ss:$16 sps:$4 sm:$0xff]  }
 0x1c5   : > { %904 = vmatprep.subr.bf16.mxu0 %v1394_v14  ;;  %945 = vmatprep.subr.bf16.mxu1 %v1408_v30  ;;  %v1404_v32 = vld [vmem:[#allocation6 + $0x60] ss:$16 sps:$4 sm:$0xff]   ;;  %v1406_v33 = vld [vmem:[#allocation6 + $0x84] ss:$16 sps:$4 sm:$0xff]   ;;  %v1414_v34 = vld [vmem:[#allocation6 + $0x4c] ss:$16 sps:$4 sm:$0xff]  }
 0x1c6   : > { %v1417_v35 = vld [vmem:[#allocation6 + $0x48] ss:$16 sps:$4 sm:$0xff]   ;;  %v1420_v36 = vld [vmem:[#allocation6 + $0x6c] ss:$16 sps:$4 sm:$0xff]   ;;  %v1410_v37 = vld [vmem:[#allocation6 + $0x80] ss:$16 sps:$4 sm:$0xff]  }
 0x1c7   : > { %v1412_v38 = vld [vmem:[#allocation6 + $0xa4] ss:$16 sps:$4 sm:$0xff]   ;;  %v1423_v39 = vld [vmem:[#allocation6 + $0x68] ss:$16 sps:$4 sm:$0xff]   ;;  %v1426_v40 = vld [vmem:[#allocation6 + $0x8c] ss:$16 sps:$4 sm:$0xff]  }
 0x1c8   : > { %905 = vmatpush1.bf16.msra.mxu0 %v1396_v15  ;;  %946 = vmatpush1.bf16.msra.mxu1 %v1411_v31  ;;  %v1416_v41 = vld [vmem:[#allocation6 + $0xa0] ss:$16 sps:$4 sm:$0xff]   ;;  %v1418_v42 = vld [vmem:[#allocation6 + $0xc4] ss:$16 sps:$4 sm:$0xff]   ;;  %v1429_v43 = vld [vmem:[#allocation6 + $0x88] ss:$16 sps:$4 sm:$0xff]  }
 0x1c9   : > { %906 = vmatprep.subr.bf16.mxu0 %v1397_v25  ;;  %947 = vmatprep.subr.bf16.mxu1 %v1414_v34  ;;  %v1422_v44 = vld [vmem:[#allocation6 + $0xc0] ss:$16 sps:$4 sm:$0xff]   ;;  %v1430_v45 = vld [vmem:[#allocation6 + $0xac] ss:$16 sps:$4 sm:$0xff]   ;;  %v1424_v46 = vld [vmem:[#allocation6 + $0xe4] ss:$16 sps:$4 sm:$0xff]  }
 0x1ca   : > { %v1432_v47 = vld [vmem:[#allocation6 + $0xa8] ss:$16 sps:$4 sm:$0xff]   ;;  %v1433_v48 = vld [vmem:[#allocation6 + $0xcc] ss:$16 sps:$4 sm:$0xff]   ;;  %v1428_v49 = vld [vmem:[#allocation6 + $0xe0] ss:$16 sps:$4 sm:$0xff]  }
 0x1cb   : > { %v708_v50 = vld [vmem:[%s1896_s9] sm:$0xff]  ;;  %v1435_v51 = vld [vmem:[#allocation6 + $0xc8] ss:$16 sps:$4 sm:$0xff]   ;;  %v1436_v52 = vld [vmem:[#allocation6 + $0xec] ss:$16 sps:$4 sm:$0xff]   ;;  %vm1551_vm8 = vmmov 0  }
 0x1cc   : > { %907 = vmatpush1.bf16.msra.mxu0 %v1399_v28  ;;  %948 = vmatpush1.bf16.msra.mxu1 %v1417_v35  ;;  %v709_v53 = vpack.c.bf16 %v708_v50, %v708_v50  ;;  %v1438_v54 = vld [vmem:[#allocation6 + $0xe8] ss:$16 sps:$4 sm:$0xff]   ;;  %v1439_v55 = vld [vmem:[%s1893_s6] sm:$0xff]   ;;  %v1441_v58 = vld [vmem:[%s1893_s6 + $0x10] sm:$0xff]   ;;  %s1244_s28 = sshll.u32 %s1541_s5, 3  ;;  %s697_s5 = sadd.s32 1, %s1541_s5  }
 0x1cd   : > { %908 = vmatprep.subr.bf16.mxu0 %v1400_v29  ;;  %949 = vmatprep.subr.bf16.mxu1 %v1420_v36  ;;  %v1440_v57 = vld [vmem:[%s1893_s6 + $0x8] sm:$0xff]   ;;  %v1442_v59 = vld [vmem:[%s1893_s6 + $0x18] sm:$0xff]   ;;  %v1443_v60 = vld [vmem:[%s1893_s6 + $0x20] sm:$0xff]   ;;  %s699_s1 = sshra.s32 %s1244_s28, 3  ;;  %s1127_s3 = scalar_lea.vmem [#allocation8], %s1244_s28 }
 0x1ce   : > { %v1444_v61 = vld [vmem:[%s1893_s6 + $0x28] sm:$0xff]   ;;  %v1445_v62 = vld [vmem:[%s1893_s6 + $0x30] sm:$0xff]   ;;  %v1446_v63 = vld [vmem:[%s1893_s6 + $0x38] sm:$0xff]   ;;  %s1291_s2 = sshll.u32 %s699_s1, 5  ;;  %p694_p2 = scmp.ge.s32.totalorder %s697_s5, 16  }
 0x1cf   : > { %s703_s29 = scalar_lea.vmem [#allocation2], %s1291_s2  ;;  %v1007_v25 = vld [vmem:[%s1897_s10] sm:$0xff]  ;;  %s1552_s14 = smov (%p694_p2), [#allocation8]  }
 0x1d0   : > { %909 = vmatpush1.bf16.msra.mxu0 %v1404_v32  ;;  %950 = vmatpush1.bf16.msra.mxu1 %v1423_v39  ;;  %v704_v1 = vld [vmem:[%s703_s29] sm:$0xff]  ;;  %v705_v2 = vld [vmem:[%s703_s29 + $0x8] sm:$0xff]  ;;  %v706_v11 = vld [vmem:[%s703_s29 + $0x10] sm:$0xff]  ;;  %s1134_s18 = sshll.u32 (%p694_p2), %s1552_s14, 4  ;;  %s1135_s18 = int_to_ptr.vmem [resolvable:$true] %s1134_s18 }
 0x1d1   : > { %910 = vmatprep.subr.bf16.mxu0 %v1406_v33  ;;  %951 = vmatprep.subr.bf16.mxu1 %v1426_v40  ;;  %v707_v20 = vld [vmem:[%s703_s29 + $0x18] sm:$0xff]  ;;  %v1282_v36 = vld [vmem:[%s1894_s7] ss:$0 sm:$0xff]  ;;  %s1507_s19 = scalar_lea.vmem (%p694_p2), %s1135_s18, 2048  ;;  %p1512_p4 = scmp.lt.s32.totalorder (%p694_p2), %s1135_s18, %s1135_s18 }
 0x1d2   :  { %p1508_p3 = scmp.ne.s32.totalorder (%p694_p2), %s1135_s18, %s1507_s19  ;;  %p1513_p5 = scmp.lt.s32.totalorder (%p694_p2), %s1507_s19, %s1507_s19 }
 0x1d4   : > { %911 = vmatpush1.bf16.msra.mxu0 %v1410_v37  ;;  %952 = vmatpush1.bf16.msra.mxu1 %v1429_v43  ;;  %p1514_p6 = por (%p694_p2), %p1513_p5, %p1512_p4 }
 0x1d5   : > { %912 = vmatprep.subr.bf16.mxu0 %v1412_v38  ;;  %953 = vmatprep.subr.bf16.mxu1 %v1430_v45 }
 0x1d6   :  { %p1515_p7 = pnand (%p694_p2), %p1514_p6, %p1508_p3 }
 0x1d8   : > { %913 = vmatpush1.bf16.msra.mxu0 %v1416_v41  ;;  %954 = vmatpush1.bf16.msra.mxu1 %v1432_v47 }
 0x1d9   : > { %914 = vmatprep.subr.bf16.mxu0 %v1418_v42  ;;  %955 = vmatprep.subr.bf16.mxu1 %v1433_v48 }
 0x1dc   : > { %915 = vmatpush1.bf16.msra.mxu0 %v1422_v44  ;;  %956 = vmatpush1.bf16.msra.mxu1 %v1435_v51 }
 0x1dd   : > { %916 = vmatprep.subr.bf16.mxu0 %v1424_v46  ;;  %957 = vmatprep.subr.bf16.mxu1 %v1436_v52 }
 0x1e0   : > { %917 = vmatpush1.bf16.msra.mxu0 %v1428_v49  ;;  %958 = vmatpush1.bf16.msra.mxu1 %v1438_v54 }
 0x1e1   : > { %1301 = vmatprep.subr.bf16.mxu0 %v1550_v56 }
 0x1e3   : > { %935 = vmatmul.mubr.bf16.vlgmr.msra.gmra.mrb[0].mxu0 %v709_v53  ;;  %976 = vmatmul.mubr.bf16.vlgmr.msra.gmra.mrb[0].mxu1 %v709_v53 }
 0x1e4   : > { %1302 = vmatpush3.bf16.msra.mxu0 %v1439_v55  ;;  %1317 = vmatprep.mubr.msk.bf16.mxu0 %vm1551_vm8, %v1550_v56 }
 0x1e5   : > { %1303 = vmatprep.subr.bf16.mxu0 %v1550_v56 }
 0x1e8   : > { %1304 = vmatpush3.bf16.msra.mxu0 %v1440_v57 }
 0x1e9   : > { %1305 = vmatprep.subr.bf16.mxu0 %v1550_v56 }
 0x1ec   : > { %1306 = vmatpush3.bf16.msra.mxu0 %v1441_v58 }
 0x1ed   : > { %1307 = vmatprep.subr.bf16.mxu0 %v1550_v56 }
 0x1f0   : > { %1308 = vmatpush3.bf16.msra.mxu0 %v1442_v59 }
 0x1f1   : > { %1309 = vmatprep.subr.bf16.mxu0 %v1550_v56 }
 0x1f4   : > { %1310 = vmatpush3.bf16.msra.mxu0 %v1443_v60 }
 0x1f5   : > { %1311 = vmatprep.subr.bf16.mxu0 %v1550_v56 }
 0x1f8   : > { %1312 = vmatpush3.bf16.msra.mxu0 %v1444_v61 }
 0x1f9   : > { %1313 = vmatprep.subr.bf16.mxu0 %v1550_v56 }
 0x1fc   : > { %1314 = vmatpush3.bf16.msra.mxu0 %v1445_v62 }
 0x1fd   : > { %1315 = vmatprep.subr.bf16.mxu0 %v1550_v56 }
 0x200   : > { %1316 = vmatpush3.bf16.msra.mxu0 %v1446_v63 }
 0x2b6   : > { %v936_v3 = vpop.f32.mrb[0].mxu0  ;;  %v977_v12 = vpop.f32.mrb[0].mxu1 }
 0x2b7   : > { %v984_v4 = vadd.f32 %v936_v3, %v704_v1  ;;  %v938_v5 = vpop.f32.mrb[1].mxu0  ;;  %v979_v16 = vpop.f32.mrb[1].mxu1  ;;  %v986_v17 = vadd.f32 %v977_v12, %v706_v11 }
 0x2b8   : > { %v985_v6 = vadd.f32 %v938_v5, %v705_v2  ;;  %v940_v7 = vpop.f32.mrb[2].mxu0  ;;  %v981_v18 = vpop.f32.mrb[2].mxu1  ;;  %v987_v22 = vadd.f32 %v979_v16, %v707_v20 }
 0x2b9   : > { %v1279_v8 = vmul.f32 -1.442695, %v984_v4  ;;  %v941_v9 = vpop.f32.mrb[3].mxu0  ;;  %v982_v19 = vpop.f32.mrb[3].mxu1  ;;  %v1281_v21 = vmul.f32 -1.442695, %v986_v17 }
 0x2ba   : > { %v1280_v10 = vmul.f32 -1.442695, %v985_v6 }
 0x2bb   : > { %1447 = vpow2.f32 %v1279_v8 }
 0x2bc   : > { %1449 = vpow2.f32 %v1280_v10 }
 0x2bd   : > { %1451 = vpow2.f32 %v1281_v21 }
 0x2be   : > { %1453 = vtanh.f32 %v987_v22 }
 0x2c5   : > { %v1448_v23 = vpop.eup %1447 }
 0x2c6   : > { %v1450_v0 = vpop.eup %1449  ;;  %v997_v13 = vadd.f32 1.0, %v1448_v23 }
 0x2c7   : > { %v998_v24 = vadd.f32 1.0, %v1450_v0  ;;  %v1452_v14 = vpop.eup %1451 }
 0x2c8   : > { %1455 = vrcp.f32 %v997_v13  ;;  %v1454_v15 = vpop.eup %1453  ;;  %v999_v27 = vadd.f32 1.0, %v1452_v14 }
 0x2c9   : > { %1457 = vrcp.f32 %v998_v24 }
 0x2ca   : > { %1459 = vrcp.f32 %v999_v27 }
 0x2d2   : > { %v1456_v26 = vpop.eup %1455 }
 0x2d3   : > { %v1458_v28 = vpop.eup %1457  ;;  %v1009_v29 = vmul.f32 %v1456_v26, %v1454_v15 }
 0x2d4   : > { %v1008_v30 = vmul.f32 %v1458_v28, %v1007_v25  ;;  %v1460_v32 = vpop.eup %1459 }
 0x2d6   : > { %v1010_v31 = vadd.f32 %v1009_v29, %v1008_v30 }
 0x2d8   : > { %1461 = vtanh.f32 %v1010_v31  ;;  %1013 = vst [vmem:[%s1897_s10] sm:$0xff] %v1010_v31 }
 0x2e2   : > { %v1462_v33 = vpop.eup %1461 }
 0x2e3   : > { %v1012_v34 = vmul.f32 %v1462_v33, %v1460_v32 }
 0x2e5   : > { %1014 = vst [vmem:[%s1896_s9] sm:$0xff] %v1012_v34  ;;  %v1015_v35 = vpack.c.bf16 %v1012_v34, %v1012_v34 }
 0x2e7   : > { %1318 = vmatmul.mubr.bf16.vlgmr.msra.gmra.mrb[4].mxu0 %v1015_v35 }
 0x3b7   :  { %696 = sbr.rel (!%p694_p2) target bundleno = 449 (0x1c1), region = 85 }
 0x3ba   : > { %v1121_v37 = vpop.f32.mrb[4].mxu0 }
 0x3bb   : > { %v1122_v38 = vadd.f32 %v1282_v36, %v1121_v37  ;;  %v1319_v39 = vpop.f32.mrb[5].mxu0 }
 0x3bc   : > { %v1124_v40 = vpop.f32.mrb[6].mxu0 }
 0x3bd   : > { %1128 = vst [vmem:[%s1127_s3] sm:$0xff] %v1122_v38  ;;  %v1320_v41 = vpop.f32.mrb[7].mxu0 }
 0x3be   :  { %1518 = shalt.err (!%p1515_p7)
}
 0x3bf   :  { %s1519_s4 = scalar_lea.hbm %s1895_s8, 2048 }
 0x3c0   :  { %p1520_p8 = scmp.ne.s32.totalorder %s1895_s8, %s1519_s4  ;;  %p1523_p9 = scmp.lt.u32.totalorder %s1519_s4, %s1895_s8 }
 0x3c2   :  { %p1525_p10 = pnand %p1523_p9, %p1520_p8 }
 0x3c4   :  { %1528 = shalt.err (!%p1525_p10)
}
 0x3c5   :  { %s1553_s6 = smov 128   ;;  %s1554_s7 = smov 8  }
 0x3c6   :  { %1140 = dma.vmem_to_hbm [thread:$0]  %s1135_s18, 2048, %s1895_s8, [#allocation5], %s1553_s6, %s1553_s6, %s1554_s7  }
 0x3c7   :  { %1537 = dma.done.wait [#allocation5], 2048  }
 0x3c8   :  { %1538 = vsyncadd [#allocation5], 4294965248 }
 0x3c9   :  { %1152 = vsyncpa [#allocation4], 1 }
 0x3ca   :  { %1153 = vsyncpa [#allocation7], 1 }
 0x3cb   :  { %1154 = vsyncpa [#allocation5], 1 }

</bundles_post_ra>
